<compile_context>
chip_gen: v7x
topology: tpu7x:2x2x1
jax: 0.10.0
libtpu: 0.0.40
codegen_flags: <defaults>
</compile_context>

<pallas_src>
import functools

import jax
import jax.numpy as jnp
from jax.experimental import pallas as pl
from jax.experimental.pallas import tpu as pltpu


def _round_up(n, m):
    return ((n + m - 1) // m) * m


def _has_bf16_eup():
    """bf16 VPU/EUP exists on v6e/v7x only (v5e and older are f32-only)."""
    try:
        kind = jax.devices()[0].device_kind.lower()
    except Exception:
        return False
    return ("v6" in kind) or ("v7" in kind)


def _pick_block_b(B, S):
    """Batch tile heuristic (review items 1, 5, 8):
       * m_rows = TB*S targets ~1024 rows per grid step,
       * TB is a multiple of 8 (sublane-full output block),
       * TB divides B when possible (avoids the tail-pad HBM copy),
       * grid >= 2 when the batch allows it (v7x megacore)."""
    cap = max(8, (1024 // max(S, 1)) // 8 * 8)      # rows-target / S, mult of 8
    b8 = _round_up(B, 8)
    if b8 <= cap:
        tb = b8
    else:
        tb = None
        for cand in range(cap, 7, -8):              # largest mult-of-8 divisor
            if B % cand == 0:
                tb = cand
                break
        if tb is None:
            tb = cap                                # tail-pad fallback
    # Split a single-tile grid in two so both v7x TensorCores have work.
    if tb >= B and B > 8 and tb % 16 == 0:
        tb //= 2
    return max(tb, 8)


def _attention_kernel(x_ref, w1_ref, b1_ref, w2_ref, ind_ref, o_ref,
                      *, seq_len, bf16_eup):
    # x_ref:   (TB*S, D)   rows for TB batch elements (batch-major), x dtype
    # w1_ref:  (D, Hp)     l1 weight (in, out), zero-padded lanes, x dtype
    # b1_ref:  (1, Hp)     l1 bias, f32
    # w2_ref:  (1, Hp)     l2 weight, f32
    # ind_ref: (TB, TB*S)  block-diagonal indicator (resident, DMA'd once), f32
    # o_ref:   (TB, D)     pooled output, one row per batch element
    m_rows, _ = x_ref.shape
    tb = o_ref.shape[0]

    x2d = x_ref[...]                                              # (M, D)

    # --- l1: one big MXU matmul over all TB*S rows, f32 accumulation ----------
    pre = (jnp.dot(x2d, w1_ref[...], preferred_element_type=jnp.float32)
           + b1_ref[...])                                         # (M, Hp) f32
    if bf16_eup:
        # v6e/v7x bf16 EUP runs ~2x the f32 rate; only used when x is bf16
        # anyway, so the extra quantization is within that path's tolerance.
        h = jnp.tanh(pre.astype(jnp.bfloat16))                    # (M, Hp) bf16
    else:
        h = jnp.tanh(pre)                                         # (M, Hp) f32

    # --- l2 (out_features == 1): VPU multiply + lane reduce, no N=1 matmul ----
    # Scores kept in a dense 2-D (TB, S) layout for the softmax (review item 2).
    h3 = h.reshape(tb, seq_len, h.shape[-1])                      # (TB, S, Hp)
    scores = jnp.sum(h3 * w2_ref[...], axis=-1)                   # (TB, S) f32

    # --- softmax over the sequence axis (PyTorch dim=1), f32 math -------------
    s_max = jnp.max(scores, axis=1, keepdims=True)                # (TB, 1)
    e = jnp.exp(scores - s_max)                                   # (TB, S)
    denom = jnp.sum(e, axis=1, keepdims=True)                     # (TB, 1)
    p = e * pl.reciprocal(denom, approx=True)                     # (TB, S)

    # --- pooled output: out[b,:] = sum_s p[b,s] * x[b,s,:] --------------------
    # Fold p into the (hoisted) block-diagonal selector and run the sequence
    # reduction as a single (TB, M) @ (M, D) MXU matmul; x stays in its native
    # dtype on the MXU (review items 3 and 4).
    p_flat = p.reshape(1, m_rows)                                 # (1, M)
    pool = (ind_ref[...] * p_flat).astype(x2d.dtype)              # (TB, M)
    out = jnp.dot(pool, x2d, preferred_element_type=jnp.float32)  # (TB, D) f32
    o_ref[...] = out.astype(o_ref.dtype)


def attention_forward(x, w1, b1, w2, *, block_b=None):
    """x: (B, S, D); w1: (D, H); b1: (H,); w2: (H,)  ->  (B, D).

    The MXU input dtype is x.dtype: pass bf16 x (from an upstream bf16
    producer) to get the bf16 path with no extra HBM cast traffic; all bias /
    softmax / accumulation math is f32 on every generation.
    """
    B, S, D = x.shape
    H = w1.shape[1]
    out_dtype = x.dtype
    compute_dtype = x.dtype

    # Zero-pad the hidden dim to a lane-dense multiple of 128 (exact transform).
    Hp = _round_up(H, 128)
    if Hp != H:
        w1 = jnp.pad(w1, ((0, 0), (0, Hp - H)))
        b1 = jnp.pad(b1, ((0, Hp - H),))
        w2 = jnp.pad(w2, ((0, Hp - H),))
    w1 = w1.astype(compute_dtype)                 # small, cheap cast
    b1_2d = b1.reshape(1, Hp).astype(jnp.float32)
    w2_2d = w2.reshape(1, Hp).astype(jnp.float32)

    if block_b is None:
        tb = _pick_block_b(B, S)
    else:
        tb = min(_round_up(int(block_b), 8), _round_up(B, 8))
    Bp = _round_up(B, tb)

    # Flatten the batch/sequence axes outside the kernel (free XLA reshape).
    x2d = x.reshape(B * S, D)
    if Bp != B:
        # Tail-pad fallback only (the heuristic avoids this whenever B has a
        # suitable divisor).  Zero rows give a uniform softmax over zero x,
        # i.e. zero padded outputs, sliced off below.
        x2d = jnp.pad(x2d, ((0, (Bp - B) * S), (0, 0)))

    m_rows = tb * S

    # Block-diagonal indicator, hoisted out of the kernel (same for every grid
    # step -> constant index_map -> DMA'd into VMEM once).
    row = jnp.arange(tb, dtype=jnp.int32)[:, None]
    col = jnp.arange(m_rows, dtype=jnp.int32)[None, :]
    ind = (col // S == row).astype(jnp.float32)                   # (TB, M)

    bf16_eup = (compute_dtype == jnp.bfloat16) and _has_bf16_eup()

    grid = (Bp // tb,)
    kernel = functools.partial(_attention_kernel, seq_len=S, bf16_eup=bf16_eup)

    # TODO(synk): if S is not a multiple of 8 the in-kernel reshapes may force
    # a VMEM relayout (correct, just slower); a masked-score S-padding path
    # would avoid that at the cost of extra wrapper HBM traffic.
    out = pl.pallas_call(
        kernel,
        out_shape=jax.ShapeDtypeStruct((Bp, D), out_dtype),
        grid_spec=pltpu.PrefetchScalarGridSpec(
            num_scalar_prefetch=0,
            grid=grid,
            in_specs=[
                pl.BlockSpec((m_rows, D), lambda i: (i, 0)),    # TB*S rows of x
                pl.BlockSpec((D, Hp), lambda i: (0, 0)),        # W1 (resident)
                pl.BlockSpec((1, Hp), lambda i: (0, 0)),        # b1
                pl.BlockSpec((1, Hp), lambda i: (0, 0)),        # w2
                pl.BlockSpec((tb, m_rows), lambda i: (0, 0)),   # indicator
            ],
            out_specs=pl.BlockSpec((tb, D), lambda i: (i, 0)),  # dense (TB, D)
        ),
        compiler_params=pltpu.CompilerParams(
            dimension_semantics=("parallel",),
            vmem_limit_bytes=32 * 1024 * 1024,
        ),
    )(x2d, w1, b1_2d, w2_2d, ind)
    return out[:B]


def attention_reference(x, w1, b1, w2):
    h = jnp.tanh(jnp.einsum("bsd,dh->bsh", x, w1) + b1)
    s = jnp.einsum("bsh,h->bs", h, w2)[..., None]       # (B, S, 1)
    p = jax.nn.softmax(s, axis=1)
    return jnp.sum(x * p, axis=1)


if __name__ == "__main__":
    B, S, D, H = 16, 8, 32, 16

    key = jax.random.PRNGKey(0)
    kx, kw1, kb1, kw2 = jax.random.split(key, 4)
    x = jax.random.normal(kx, (B, S, D), dtype=jnp.float32)
    w1 = jax.random.normal(kw1, (D, H), dtype=jnp.float32) * 0.1
    b1 = jax.random.normal(kb1, (H,), dtype=jnp.float32) * 0.1
    w2 = jax.random.normal(kw2, (H,), dtype=jnp.float32) * 0.1

    ref = attention_reference(x, w1, b1, w2)

    # f32 path (tolerance covers the EUP approximate reciprocal in the softmax).
    out = jax.jit(attention_forward)(x, w1, b1, w2)
    out = jax.block_until_ready(out)
    assert out.shape == (B, D)
    assert jnp.allclose(out, ref, atol=5e-3, rtol=5e-3), (
        f"f32 mismatch vs reference: {jnp.max(jnp.abs(out - ref))}")

    # bf16 path: x arrives in bf16 from the producer (no wrapper-side cast of
    # the big array inside the kernel wrapper); f32 accumulation + f32 softmax.
    x_bf16 = x.astype(jnp.bfloat16)
    out_bf16 = jax.jit(attention_forward)(x_bf16, w1, b1, w2)
    out_bf16 = jax.block_until_ready(out_bf16)
    assert out_bf16.shape == (B, D)
    assert jnp.allclose(out_bf16.astype(jnp.float32), ref,
                        atol=5e-2, rtol=5e-2), (
        f"bf16 mismatch vs reference: "
        f"{jnp.max(jnp.abs(out_bf16.astype(jnp.float32) - ref))}")

    print("KERNEL_OK")
</pallas_src>

<mosaic_0001>
module attributes {stable_mosaic.version = 11 : i64} {
  func.func @_attention_kernel(%arg0: i32, %arg1: memref<64x32xf32, #tpu.memory_space<vmem>>, %arg2: memref<32x128xf32, #tpu.memory_space<vmem>>, %arg3: memref<1x128xf32, #tpu.memory_space<vmem>>, %arg4: memref<1x128xf32, #tpu.memory_space<vmem>>, %arg5: memref<8x64xf32, #tpu.memory_space<vmem>>, %arg6: memref<8x32xf32, #tpu.memory_space<vmem>>) attributes {dimension_semantics = [#tpu.dimension_semantics<parallel>], iteration_bounds = array<i64: 2>, scalar_prefetch = 0 : i64, scratch_operands = 0 : i64, tpu.core_type = #tpu.core_type<tc>, window_params = [{transform_indices = @transform_0, window_bounds = array<i64: 64, 32>}, {pipeline_mode = #tpu.pipeline_mode<synchronous>, transform_indices = @transform_1, window_bounds = array<i64: 32, 128>}, {pipeline_mode = #tpu.pipeline_mode<synchronous>, transform_indices = @transform_2, window_bounds = array<i64: 1, 128>}, {pipeline_mode = #tpu.pipeline_mode<synchronous>, transform_indices = @transform_3, window_bounds = array<i64: 1, 128>}, {pipeline_mode = #tpu.pipeline_mode<synchronous>, transform_indices = @transform_4, window_bounds = array<i64: 8, 64>}, {transform_indices = @transform_5, window_bounds = array<i64: 8, 32>}]} {
    %c0 = arith.constant 0 : index
    %c0_0 = arith.constant 0 : index
    %0 = vector.load %arg1[%c0, %c0_0] : memref<64x32xf32, #tpu.memory_space<vmem>>, vector<64x32xf32>
    %c0_1 = arith.constant 0 : index
    %c0_2 = arith.constant 0 : index
    %1 = vector.load %arg2[%c0_1, %c0_2] : memref<32x128xf32, #tpu.memory_space<vmem>>, vector<32x128xf32>
    %cst = arith.constant dense<0.000000e+00> : vector<64x128xf32>
    %2 = tpu.matmul %0, %1, %cst {dimension_numbers = #tpu.dot_dimension_numbers<[1], [0], [0], [1], [0, 0, 1, 1], [], []>} : vector<64x32xf32>, vector<32x128xf32>, vector<64x128xf32> -> vector<64x128xf32>
    %c0_3 = arith.constant 0 : index
    %c0_4 = arith.constant 0 : index
    %3 = vector.load %arg3[%c0_3, %c0_4] : memref<1x128xf32, #tpu.memory_space<vmem>>, vector<1x128xf32>
    %4 = vector.broadcast %3 : vector<1x128xf32> to vector<64x128xf32>
    %5 = arith.addf %2, %4 : vector<64x128xf32>
    %6 = math.tanh %5 : vector<64x128xf32>
    %7 = vector.shape_cast %6 : vector<64x128xf32> to vector<8x8x128xf32>
    %c0_5 = arith.constant 0 : index
    %c0_6 = arith.constant 0 : index
    %8 = vector.load %arg4[%c0_5, %c0_6] : memref<1x128xf32, #tpu.memory_space<vmem>>, vector<1x128xf32>
    %9 = vector.shape_cast %8 : vector<1x128xf32> to vector<1x1x128xf32>
    %10 = vector.broadcast %9 : vector<1x1x128xf32> to vector<8x8x128xf32>
    %11 = arith.mulf %7, %10 : vector<8x8x128xf32>
    %cst_7 = arith.constant dense<0.000000e+00> : vector<8x8xf32>
    %12 = vector.multi_reduction <add>, %11, %cst_7 [2] : vector<8x8x128xf32> to vector<8x8xf32>
    %cst_8 = arith.constant dense<0xFF800000> : vector<8xf32>
    %13 = vector.multi_reduction <maximumf>, %12, %cst_8 [1] : vector<8x8xf32> to vector<8xf32>
    %14 = vector.shape_cast %13 : vector<8xf32> to vector<8x1xf32>
    %15 = vector.broadcast %14 : vector<8x1xf32> to vector<8x8xf32>
    %16 = arith.subf %12, %15 : vector<8x8xf32>
    %17 = math.exp %16 : vector<8x8xf32>
    %cst_9 = arith.constant dense<0.000000e+00> : vector<8xf32>
    %18 = vector.multi_reduction <add>, %17, %cst_9 [1] : vector<8x8xf32> to vector<8xf32>
    %19 = vector.shape_cast %18 : vector<8xf32> to vector<8x1xf32>
    %20 = tpu.reciprocal %19 {approx = true} : vector<8x1xf32> -> vector<8x1xf32>
    %21 = vector.broadcast %20 : vector<8x1xf32> to vector<8x8xf32>
    %22 = arith.mulf %17, %21 : vector<8x8xf32>
    %23 = vector.shape_cast %22 : vector<8x8xf32> to vector<1x64xf32>
    %c0_10 = arith.constant 0 : index
    %c0_11 = arith.constant 0 : index
    %24 = vector.load %arg5[%c0_10, %c0_11] : memref<8x64xf32, #tpu.memory_space<vmem>>, vector<8x64xf32>
    %25 = vector.broadcast %23 : vector<1x64xf32> to vector<8x64xf32>
    %26 = arith.mulf %24, %25 : vector<8x64xf32>
    %cst_12 = arith.constant dense<0.000000e+00> : vector<8x32xf32>
    %27 = tpu.matmul %26, %0, %cst_12 {dimension_numbers = #tpu.dot_dimension_numbers<[1], [0], [0], [1], [0, 0, 1, 1], [], []>} : vector<8x64xf32>, vector<64x32xf32>, vector<8x32xf32> -> vector<8x32xf32>
    %c0_13 = arith.constant 0 : index
    %c0_14 = arith.constant 0 : index
    %28 = vector.load %arg6[%c0_13, %c0_14] : memref<8x32xf32, #tpu.memory_space<vmem>>, vector<8x32xf32>
    tpu.vector_store %arg6[%c0_13, %c0_14], %27 {strides = array<i32>} : memref<8x32xf32, #tpu.memory_space<vmem>>, vector<8x32xf32>,
    return
  }
  func.func @transform_0(%arg0: i32) -> (i32, i32) {
    %c0_i32 = arith.constant 0 : i32
    %c0_i32_0 = arith.constant 0 : i32
    return %arg0, %c0_i32 : i32, i32
  }
  func.func @transform_1(%arg0: i32) -> (i32, i32) {
    %c0_i32 = arith.constant 0 : i32
    %c0_i32_0 = arith.constant 0 : i32
    %c0_i32_1 = arith.constant 0 : i32
    return %c0_i32, %c0_i32_0 : i32, i32
  }
  func.func @transform_2(%arg0: i32) -> (i32, i32) {
    %c0_i32 = arith.constant 0 : i32
    %c0_i32_0 = arith.constant 0 : i32
    %c0_i32_1 = arith.constant 0 : i32
    return %c0_i32, %c0_i32_0 : i32, i32
  }
  func.func @transform_3(%arg0: i32) -> (i32, i32) {
    %c0_i32 = arith.constant 0 : i32
    %c0_i32_0 = arith.constant 0 : i32
    %c0_i32_1 = arith.constant 0 : i32
    return %c0_i32, %c0_i32_0 : i32, i32
  }
  func.func @transform_4(%arg0: i32) -> (i32, i32) {
    %c0_i32 = arith.constant 0 : i32
    %c0_i32_0 = arith.constant 0 : i32
    %c0_i32_1 = arith.constant 0 : i32
    return %c0_i32, %c0_i32_0 : i32, i32
  }
  func.func @transform_5(%arg0: i32) -> (i32, i32) {
    %c0_i32 = arith.constant 0 : i32
    %c0_i32_0 = arith.constant 0 : i32
    return %arg0, %c0_i32 : i32, i32
  }
}

</mosaic_0001>

<bundles_post_ra>
// kernel: attention_forward.1
= control target key start
LH: loop header
LB: loop body
LE: loop exit
PB: predicated region body
PF: predicated region fallthrough
CT: control target
= control target key end

     0   :  { %10 = vsyncpa [#allocation3], 0  ;;  %s1442_s0 = inlined_call_operand.vmem [shape: f32[128,32], index: 0, kind: input, shape index: {}]   ;;  %s1443_s1 = inlined_call_operand.vmem [shape: f32[32,128], index: 1, kind: input, shape index: {}]   ;;  %s1444_s2 = inlined_call_operand.vmem [shape: f32[1,128], index: 2, kind: input, shape index: {}]   ;;  %s1445_s3 = inlined_call_operand.vmem [shape: f32[1,128], index: 3, kind: input, shape index: {}]   ;;  %s1446_s4 = inlined_call_operand.vmem [shape: f32[8,64], index: 4, kind: input, shape index: {}]   ;;  %s1447_s5 = inlined_call_operand.hbm [shape: f32[16,32], index: 5, kind: output, shape index: {}]  }
   0x1   :  { %12 = vsyncpa [#allocation3 + $0x1], 0  ;;  %s1186_s18 = smov 0   ;;  %s1188_s19 = smov 0  }
   0x2   :  { %s1190_s20 = smov 0   ;;  %s1192_s21 = smov 0  }
   0x3 LB: > { %s1207_s22 = sadd.s32 4294967295, %s1149_s21   ;;  %s906_s23 = sadd.s32 4294967294, %s1149_s21   ;;  %s1149_s21 = sphi %s1192_s21, %s1453_s21   ;;  %s1145_s20 = sphi %s1190_s20, %s1452_s20   ;;  %s1141_s19 = sphi %s1188_s19, %s1451_s19   ;;  %s1137_s18 = sphi %s1186_s18, %s1450_s18  }
   0x4   : > { %s1211_s24 = sadd.s32 1, %s1149_s21   ;;  %s135_s25 = sadd.s32 1, %s1145_s20 }
   0x5   : > { %s132_s26 = ssub.s32 %s1149_s21, %s1211_s24  ;;  %p145_p0 = scmp.ne.s32.totalorder %s1145_s20, %s1141_s19 }
   0x6   : > { %p133_p1 = scmp.eq.s32.totalorder %s132_s26, 0  ;;  %p146_p2 = scmp.eq.s32.totalorder %s1207_s22, 1 }
   0x7   : > { %p151_p3 = scmp.ne.s32.totalorder %s1141_s19, %s1137_s18  ;;  %p152_p4 = scmp.eq.s32.totalorder %s906_s23, 1 }
   0x8   : > { %s1222_s27 = scalar_select %p133_p1, %s1145_s20, %s135_s25  }
   0x9   : > { %p1224_p5 = por %p146_p2, %p145_p0  ;;  %p1228_p6 = por %p152_p4, %p151_p3 }
   0xa   : > { %p909_p7 = scmp.ge.s32.totalorder %s1149_s21, 1  ;;  %p191_p8 = scmp.lt.s32.totalorder %s1149_s21, 3 }
   0xc   : > { %p192_p9 = pnand %p909_p7, %p191_p8 }
   0xd   : > { %v233_v0 = vld [vmem:[%s1443_s1] sm:$0xff] (!%p192_p9)  ;;  %v234_v1 = vld [vmem:[%s1443_s1 + $0x8] sm:$0xff] (!%p192_p9)  ;;  %v235_v2 = vld [vmem:[%s1443_s1 + $0x10] sm:$0xff] (!%p192_p9)  ;;  %s911_s11 = sshll.u32 (!%p192_p9), %s1207_s22, 3  ;;  %vm244_vm0 = vcmask (!%p192_p9), 261120   ;;  %v421_v48 = vlaneseq (!%p192_p9)  ;;  %vm455_vm1 = vcmask (!%p192_p9), 1041409  }
   0xe   : > { %195 = sbr.rel (%p192_p9) target bundleno = 1274 (0x4fa), region = 40  ;;  %v988_v3 = vpack.c.bf16 (!%p192_p9), %v234_v1, %v233_v0  ;;  %v236_v4 = vld [vmem:[%s1443_s1 + $0x18] sm:$0xff] (!%p192_p9)  ;;  %p220_p10 = scmp.lt.s32.totalorder (!%p192_p9), %s911_s11, 15  ;;  %v913_v14 = vld [vmem:[%s1444_s2] ss:$0 sm:$0xff] (!%p192_p9)  ;;  %vm457_vm2 = vcmask (!%p192_p9), 1042434  }
   0xf   : > { %v992_v5 = vpack.c.bf16 (!%p192_p9), %v236_v4, %v235_v2  ;;  %v922_v27 = vld [vmem:[%s1445_s3] ss:$0 sm:$0xff] (!%p192_p9)  ;;  %v1288_v49 = vand.u32 (!%p192_p9), 127, %v421_v48  ;;  %v1290_v50 = vshrl.u32 (!%p192_p9), %v421_v48, 7  ;;  %vm459_vm3 = vcmask (!%p192_p9), 1043459   ;;  %s216_s8 = sand.u32 (!%p192_p9), 1, %s1141_s19  }
  0x10   : > { %989 = vmatprep.subr.bf16.mxu0 (!%p192_p9), %v988_v3  ;;  %vm461_vm4 = vcmask (!%p192_p9), 1044484   ;;  %vm463_vm5 = vcmask (!%p192_p9), 1045509   ;;  %vm465_vm6 = vcmask (!%p192_p9), 1046534   ;;  %vm467_vm7 = vcmask (!%p192_p9), 1047559   ;;  %s910_s9 = sshll.u32 (!%p192_p9), %s216_s8, 3  ;;  %s925_s10 = sshll.u32 (!%p192_p9), %s1207_s22, 7 }
  0x11   : > { %991 = vmatpush3.bf16.msra.mxu0 (!%p192_p9), %v988_v3  ;;  %v1294_v52 = vsub.s32 (!%p192_p9), %v1288_v49, %v1290_v50  ;;  %vm470_vm8 = vcmask (!%p192_p9), 64512   ;;  %vm1153_vm9 = vmmov (!%p192_p9), 0   ;;  %vm706_vm10 = vcmask (!%p192_p9), 130112   ;;  %s1399_s15 = scalar_lea.hbm (!%p192_p9), %s1447_s5, %s925_s10  ;;  %s834_s16 = scalar_lea.sflag (!%p192_p9), [#allocation3], %s216_s8 }
  0x12   : > { %993 = vmatprep.subr.bf16.mxu0 (!%p192_p9), %v992_v5  ;;  %vm713_vm11 = vcmask (!%p192_p9), 195712   ;;  %vm720_vm12 = vcmask (!%p192_p9), 261312   ;;  %vm727_vm13 = vcmask (!%p192_p9), 326912   ;;  %vm734_vm14 = vcmask (!%p192_p9), 392512   ;;  %s1155_s22 = smov (!%p192_p9), [#allocation2]  }
  0x13   : > { %vm741_vm15 = vcmask (!%p192_p9), 458112   ;;  %s1091_s23 = sshll.u32 (!%p192_p9), %s1155_s22, 4  ;;  %s1092_s23 = int_to_ptr.vmem [resolvable:$false] %s1091_s23 }
  0x14   : > { %s1093_s25 = scalar_lea.vmem (!%p192_p9), %s1092_s23, 256 }
  0x15   : > { %s1455_s11 = smov (!%p220_p10, %s911_s11), 15  ;;  %995 = vmatpush3.bf16.msra.mxu0 %v992_v5 }
  0x16   : > { %s912_s14 = sshll.u32 %s1455_s11, 3  ;;  %s218_s11 = scalar_lea.vmem [#allocation2], %s910_s9 }
  0x17   : > { %s223_s17 = scalar_lea.vmem %s1442_s0, %s912_s14  ;;  %s847_s12 = sshll.u32 %s218_s11, 4  ;;  %s1401_s12 = int_to_ptr.vmem [resolvable:$true] %s847_s12 }
  0x18   : > { %v1250_v6 = vld [vmem:[%s223_s17] sm:$0xff]  ;;  %v1254_v7 = vld [vmem:[%s223_s17 + $0x8] sm:$0xff]  ;;  %v1256_v8 = vld [vmem:[%s223_s17 + $0x10] sm:$0xff]  ;;  %p1094_p0 = scmp.lt.s32.totalorder %s1401_s12, %s1092_s23 }
  0x19   : > { %957 = vmatprep.mubr.msk.f32.mxu0 %vm244_vm0, %v1250_v6  ;;  %v1262_v9 = vld [vmem:[%s223_s17 + $0x18] sm:$0xff]  ;;  %v1264_v10 = vld [vmem:[%s223_s17 + $0x20] sm:$0xff]  ;;  %v1270_v11 = vld [vmem:[%s223_s17 + $0x28] sm:$0xff] }
  0x1a   : > { %958 = vmatmul.mubr.msk.f32.vlgmr.msra.gmra.mrb[0].mxu0 %vm244_vm0, %v1254_v7  ;;  %v1272_v12 = vld [vmem:[%s223_s17 + $0x30] sm:$0xff]  ;;  %v1278_v13 = vld [vmem:[%s223_s17 + $0x38] sm:$0xff]  ;;  %s1087_s17 = scalar_lea.vmem %s1401_s12, 128 }
  0x1b   : > { %960 = vmatprep.mubr.msk.f32.mxu0 %vm244_vm0, %v1256_v8  ;;  %p1088_p11 = scmp.ne.s32.totalorder %s1401_s12, %s1087_s17  ;;  %p1095_p1 = scmp.lt.s32.totalorder %s1093_s25, %s1087_s17 }
  0x1d   : > { %p1089_p12 = pnand %p1088_p11, %p1224_p5  ;;  %p1096_p2 = por %p1095_p1, %p1094_p0 }
  0x1e   : > { %961 = vmatmul.mubr.msk.f32.gmra.mrb[2].mxu0 %vm244_vm0, %v1262_v9 }
  0x1f   : > { %963 = vmatprep.mubr.msk.f32.mxu0 %vm244_vm0, %v1264_v10  ;;  %p1090_p13 = pneg %p1089_p12 }
  0x21   : > { %p1097_p3 = pnand %p1096_p2, %p1090_p13 }
  0x22   : > { %964 = vmatmul.mubr.msk.f32.gmra.mrb[4].mxu0 %vm244_vm0, %v1270_v11 }
  0x23   : > { %966 = vmatprep.mubr.msk.f32.mxu0 %vm244_vm0, %v1272_v12 }
  0x26   : > { %967 = vmatmul.mubr.msk.f32.gmra.mrb[6].mxu0 %vm244_vm0, %v1278_v13 }
  0xed   : > { %v959_v15 = vpop.f32.mrb[0].mxu0 }
  0xee   : > { %v341_v16 = vadd.f32 %v959_v15, %v913_v14  ;;  %v335_v17 = vpop.f32.mrb[1].mxu0 }
  0xef   : > { %v336_v18 = vadd.f32 %v913_v14, %v335_v17 }
  0xf0   : > { %1053 = vtanh.f32 %v341_v16 }
  0xf1   : > { %v962_v19 = vpop.f32.mrb[2].mxu0  ;;  %1055 = vtanh.f32 %v336_v18 }
  0xf2   : > { %v351_v20 = vadd.f32 %v962_v19, %v913_v14  ;;  %v345_v21 = vpop.f32.mrb[3].mxu0 }
  0xf3   : > { %v346_v22 = vadd.f32 %v913_v14, %v345_v21  ;;  %v477_v21 = vsub.s32 0, %v1290_v50 }
  0xf4   : > { %1057 = vtanh.f32 %v351_v20  ;;  %v1151_v20 = vmov 0  }
  0xf5   : > { %v965_v23 = vpop.f32.mrb[4].mxu0  ;;  %1059 = vtanh.f32 %v346_v22  ;;  %1052 = vset.pattern.permute.xlu0 %v1151_v20  ;;  %1051 = vset.pattern.permute.xlu1 %v1151_v20  ;;  %v481_v22 = vsub.s32 1, %v1290_v50 }
  0xf6   : > { %v361_v24 = vadd.f32 %v965_v23, %v913_v14  ;;  %v355_v25 = vpop.f32.mrb[5].mxu0  ;;  %v485_v23 = vsub.s32 2, %v1290_v50 }
  0xf7   : > { %v356_v26 = vadd.f32 %v913_v14, %v355_v25 }
  0xf9   : > { %1061 = vtanh.f32 %v356_v26  ;;  %v968_v28 = vpop.f32.mrb[6].mxu0 }
  0xfa   : > { %v1054_v29 = vpop.eup %1053  ;;  %1063 = vtanh.f32 %v361_v24  ;;  %v371_v30 = vadd.f32 %v968_v28, %v913_v14  ;;  %v365_v31 = vpop.f32.mrb[7].mxu0  ;;  %v489_v24 = vsub.s32 3, %v1290_v50 }
  0xfb   : > { %v366_v32 = vadd.f32 %v913_v14, %v365_v31  ;;  %v390_v33 = vmul.f32 %v1054_v29, %v922_v27  ;;  %v1056_v34 = vpop.eup %1055  ;;  %v493_v29 = vsub.s32 4, %v1290_v50 }
  0xfc   : > { %v389_v37 = vmul.f32 %v1056_v34, %v922_v27 }
  0xfd   : > { %1065 = vtanh.f32 %v366_v32  ;;  %399 = vadd.xlane.f32.xlu0 %v390_v33 }
  0xfe   : > { %v1058_v35 = vpop.eup %1057  ;;  %1067 = vtanh.f32 %v371_v30 }
  0xff   : > { %v392_v36 = vmul.f32 %v1058_v35, %v922_v27  ;;  %v1060_v38 = vpop.eup %1059 }
 0x100   : > { %v391_v40 = vmul.f32 %v1060_v38, %v922_v27 }
 0x101   : > { %403 = vadd.xlane.f32.xlu1 %v392_v36  ;;  %397 = vadd.xlane.f32.xlu0 %v389_v37  ;;  %v497_v36 = vsub.s32 5, %v1290_v50 }
 0x103   : > { %v1062_v39 = vpop.eup %1061 }
 0x104   : > { %v1064_v41 = vpop.eup %1063  ;;  %v393_v42 = vmul.f32 %v1062_v39, %v922_v27 }
 0x105   : > { %401 = vadd.xlane.f32.xlu1 %v391_v40  ;;  %v394_v44 = vmul.f32 %v1064_v41, %v922_v27  ;;  %v501_v40 = vsub.s32 6, %v1290_v50 }
 0x106   : > { %405 = vadd.xlane.f32.xlu0 %v393_v42 }
 0x107   : > { %v1066_v43 = vpop.eup %1065 }
 0x108   : > { %v1068_v45 = vpop.eup %1067  ;;  %v395_v46 = vmul.f32 %v1066_v43, %v922_v27 }
 0x109   : > { %407 = vadd.xlane.f32.xlu1 %v394_v44  ;;  %v396_v47 = vmul.f32 %v1068_v45, %v922_v27  ;;  %v505_v44 = vsub.s32 7, %v1290_v50 }
 0x10a   : > { %409 = vadd.xlane.f32.xlu0 %v395_v46 }
 0x10d   : > { %411 = vadd.xlane.f32.xlu1 %v396_v47 }
 0x18a   : > { %v400_v51 = vpop.xlane.xlu0 %399 }
 0x18b   : > { %v430_v56 = vrot.slane %v400_v51, %v1294_v52 }
 0x18e   : > { %v404_v53 = vpop.xlane.xlu1 %403  ;;  %v398_v54 = vpop.xlane.xlu0 %397 }
 0x18f   : > { %v426_v55 = vrot.slane %v398_v54, %v1294_v52  ;;  %v438_v60 = vrot.slane %v404_v53, %v1294_v52 }
 0x191   : > { %v456_v61 = vsel %vm455_vm1, %v430_v56, %v426_v55 }
 0x192   : > { %v402_v57 = vpop.xlane.xlu1 %401 }
 0x193   : > { %v434_v58 = vrot.slane %v402_v57, %v1294_v52  ;;  %v406_v59 = vpop.xlane.xlu0 %405 }
 0x194   : > { %v442_v62 = vrot.slane %v406_v59, %v1294_v52 }
 0x195   : > { %v458_v63 = vsel %vm457_vm2, %v434_v58, %v456_v61 }
 0x196   : > { %v460_v0 = vsel %vm459_vm3, %v438_v60, %v458_v63  ;;  %v408_v1 = vpop.xlane.xlu1 %407 }
 0x197   : > { %v462_v2 = vsel %vm461_vm4, %v442_v62, %v460_v0  ;;  %v446_v3 = vrot.slane %v408_v1, %v1294_v52  ;;  %v410_v4 = vpop.xlane.xlu0 %409 }
 0x198   : > { %v450_v5 = vrot.slane %v410_v4, %v1294_v52 }
 0x199   : > { %v464_v14 = vsel %vm463_vm5, %v446_v3, %v462_v2 }
 0x19a   : > { %v412_v15 = vpop.xlane.xlu1 %411  ;;  %v466_v17 = vsel %vm465_vm6, %v450_v5, %v464_v14 }
 0x19b   : > { %v454_v16 = vrot.slane %v412_v15, %v1294_v52 }
 0x19d   : > { %v468_v18 = vsel %vm467_vm7, %v454_v16, %v466_v17 }
 0x19e   : > { %v471_v19 = vsel %vm470_vm8, %v468_v18, -inf }
 0x19f   : > { %472 = vmax.xlane.f32.xlu0 %v471_v19 }
 0x22c   : > { %v473_v25 = vpop.xlane.xlu0 %472 }
 0x22d   : > { %v478_v26 = vrot.slane %v473_v25, %v477_v21  ;;  %v482_v27 = vrot.slane %v473_v25, %v481_v22  ;;  %v486_v28 = vrot.slane %v473_v25, %v485_v23  ;;  %v490_v30 = vrot.slane %v473_v25, %v489_v24 }
 0x22e   : > { %v494_v37 = vrot.slane %v473_v25, %v493_v29  ;;  %v498_v41 = vrot.slane %v473_v25, %v497_v36  ;;  %v502_v45 = vrot.slane %v473_v25, %v501_v40 }
 0x22f   : > { %v515_v31 = vsub.f32 %v398_v54, %v478_v26  ;;  %v516_v32 = vsub.f32 %v400_v51, %v482_v27  ;;  %v517_v33 = vsub.f32 %v402_v57, %v486_v28  ;;  %v518_v38 = vsub.f32 %v404_v53, %v490_v30 }
 0x230   : > { %v519_v42 = vsub.f32 %v406_v59, %v494_v37  ;;  %v520_v46 = vsub.f32 %v408_v1, %v498_v41  ;;  %v506_v53 = vrot.slane %v473_v25, %v505_v44  ;;  %v521_v54 = vsub.f32 %v410_v4, %v502_v45 }
 0x231   : > { %v523_v34 = vmul.f32 1.442695, %v515_v31  ;;  %v525_v35 = vmul.f32 1.442695, %v516_v32  ;;  %v527_v39 = vmul.f32 1.442695, %v517_v33 }
 0x232   : > { %v529_v43 = vmul.f32 1.442695, %v518_v38  ;;  %v531_v47 = vmul.f32 1.442695, %v519_v42  ;;  %v533_v55 = vmul.f32 1.442695, %v520_v46  ;;  %v522_v57 = vsub.f32 %v412_v15, %v506_v53 }
 0x233   : > { %1069 = vpow2.f32 %v523_v34  ;;  %v535_v58 = vmul.f32 1.442695, %v521_v54 }
 0x234   : > { %1071 = vpow2.f32 %v525_v35  ;;  %v537_v60 = vmul.f32 1.442695, %v522_v57 }
 0x235   : > { %1073 = vpow2.f32 %v527_v39 }
 0x236   : > { %1075 = vpow2.f32 %v529_v43 }
 0x237   : > { %1077 = vpow2.f32 %v531_v47 }
 0x238   : > { %1079 = vpow2.f32 %v533_v55 }
 0x239   : > { %1081 = vpow2.f32 %v535_v58 }
 0x23a   : > { %1083 = vpow2.f32 %v537_v60  ;;  %v701_v60 = vadd.s32 4294967288, %v1288_v49 }
 0x23d   : > { %v1070_v48 = vpop.eup %1069 }
 0x23e   : > { %v1072_v51 = vpop.eup %1071  ;;  %548 = vperm.xlu1 %1051, %v1070_v48  }
 0x23f   : > { %551 = vperm.xlu0 %1052, %v1072_v51   ;;  %v1074_v56 = vpop.eup %1073 }
 0x240   : > { %v1076_v59 = vpop.eup %1075 }
 0x241   : > { %v1078_v61 = vpop.eup %1077 }
 0x242   : > { %554 = vperm.xlu1 %1051, %v1074_v56   ;;  %v1080_v62 = vpop.eup %1079 }
 0x243   : > { %v1082_v63 = vpop.eup %1081 }
 0x244   : > { %v1084_v0 = vpop.eup %1083 }
 0x246   : > { %557 = vperm.xlu1 %1051, %v1076_v59  }
 0x24a   : > { %560 = vperm.xlu1 %1051, %v1078_v61  }
 0x24e   : > { %563 = vperm.xlu1 %1051, %v1080_v62  }
 0x252   : > { %566 = vperm.xlu1 %1051, %v1082_v63  }
 0x256   : > { %569 = vperm.xlu1 %1051, %v1084_v0  }
 0x2bd   : > { %v549_v1 = vpop.permute.xlu1 %548 }
 0x2be   : > { %v552_v5 = vpop.permute.xlu0 %551  ;;  %v574_v16 = vrot.slane %v549_v1, %v1294_v52 }
 0x2bf   : > { %v578_v15 = vrot.slane %v552_v5, %v1294_v52 }
 0x2c1   : > { %v555_v2 = vpop.permute.xlu1 %554  ;;  %v603_v25 = vsel %vm455_vm1, %v578_v15, %v574_v16  ;;  %vm748_vm1 = vcmask 523712  }
 0x2c2   : > { %v582_v17 = vrot.slane %v555_v2, %v1294_v52 }
 0x2c4   : > { %v604_v27 = vsel %vm457_vm2, %v582_v17, %v603_v25  ;;  %vm758_vm2 = vcmask 523264  }
 0x2c5   : > { %v558_v3 = vpop.permute.xlu1 %557 }
 0x2c6   : > { %v586_v18 = vrot.slane %v558_v3, %v1294_v52 }
 0x2c8   : > { %v605_v30 = vsel %vm459_vm3, %v586_v18, %v604_v27 }
 0x2c9   : > { %v561_v4 = vpop.permute.xlu1 %560 }
 0x2ca   : > { %v590_v19 = vrot.slane %v561_v4, %v1294_v52 }
 0x2cc   : > { %v606_v31 = vsel %vm461_vm4, %v590_v19, %v605_v30 }
 0x2cd   : > { %v564_v14 = vpop.permute.xlu1 %563 }
 0x2ce   : > { %v594_v26 = vrot.slane %v564_v14, %v1294_v52  ;;  %v743_v14 = vadd.s32 4294967240, %v1288_v49 }
 0x2d0   : > { %v607_v33 = vsel %vm463_vm5, %v594_v26, %v606_v31  ;;  %v746_v27 = vsub.s32 %v743_v14, %v1290_v50 }
 0x2d1   : > { %v567_v20 = vpop.permute.xlu1 %566 }
 0x2d2   : > { %v598_v28 = vrot.slane %v567_v20, %v1294_v52 }
 0x2d4   : > { %v608_v35 = vsel %vm465_vm6, %v598_v28, %v607_v33  ;;  %v664_v33 = vld [vmem:[%s1446_s4] sm:$0xff] }
 0x2d5   : > { %v570_v32 = vpop.permute.xlu1 %569 }
 0x2d6   : > { %v602_v34 = vrot.slane %v570_v32, %v1294_v52 }
 0x2d8   : > { %v609_v37 = vsel %vm467_vm7, %v602_v34, %v608_v35 }
 0x2d9   : > { %v611_v38 = vsel %vm470_vm8, %v609_v37, 0.0 }
 0x2da   : > { %612 = vadd.xlane.f32.xlu1 %v611_v38 }
 0x367   : > { %v613_v39 = vpop.xlane.xlu1 %612 }
 0x368   : > { %1085 = vrcp.f32 %v613_v39 }
 0x372   : > { %v1086_v41 = vpop.eup %1085 }
 0x373   : > { %v619_v42 = vrot.slane %v1086_v41, %v477_v21  ;;  %v623_v45 = vrot.slane %v1086_v41, %v481_v22  ;;  %v627_v47 = vrot.slane %v1086_v41, %v485_v23  ;;  %v631_v54 = vrot.slane %v1086_v41, %v489_v24 }
 0x374   : > { %v635_v57 = vrot.slane %v1086_v41, %v493_v29  ;;  %v639_v22 = vrot.slane %v1086_v41, %v497_v36  ;;  %v643_v23 = vrot.slane %v1086_v41, %v501_v40  ;;  %v647_v29 = vrot.slane %v1086_v41, %v505_v44 }
 0x375   : > { %v656_v43 = vmul.f32 %v1070_v48, %v619_v42  ;;  %v657_v46 = vmul.f32 %v1072_v51, %v623_v45  ;;  %v658_v53 = vmul.f32 %v1074_v56, %v627_v47  ;;  %v659_v55 = vmul.f32 %v1076_v59, %v631_v54 }
 0x376   : > { %v660_v21 = vmul.f32 %v1078_v61, %v635_v57  ;;  %v661_v48 = vmul.f32 %v1080_v62, %v639_v22  ;;  %v997_v51 = vpack.c.bf16 %v1254_v7, %v1250_v6  ;;  %v1152_v56 = vmov 0.0|0.0  }
 0x377   : > { %674 = vperm.xlu0 %1052, %v656_v43   ;;  %996 = vmatprep.subr.bf16.mxu1 %v1152_v56  ;;  %v662_v24 = vmul.f32 %v1082_v63, %v643_v23  ;;  %v1000_v36 = vpack.c.bf16 %v1262_v9, %v1256_v8  ;;  %v663_v58 = vmul.f32 %v1084_v0, %v647_v29  ;;  %v1154_v7 = vmov 0.0  }
 0x378   : > { %998 = vmatpush3.bf16.msra.mxu1 %v997_v51  ;;  %v1003_v40 = vpack.c.bf16 %v1270_v11, %v1264_v10  ;;  %v1006_v6 = vpack.c.bf16 %v1278_v13, %v1272_v12  ;;  %985 = vmatprep.mubr.msk.f32.mxu1 %vm1153_vm9, %v1154_v7  ;;  %v708_v61 = vadd.s32 4294967280, %v1288_v49  ;;  %v715_v10 = vadd.s32 4294967272, %v1288_v49 }
 0x379   : > { %999 = vmatprep.subr.bf16.mxu1 %v1152_v56  ;;  %v722_v11 = vadd.s32 4294967264, %v1288_v49  ;;  %v704_v63 = vsub.s32 %v701_v60, %v1290_v50  ;;  %v729_v12 = vadd.s32 4294967256, %v1288_v49  ;;  %v736_v0 = vadd.s32 4294967248, %v1288_v49 }
 0x37a   : > { %v711_v13 = vsub.s32 %v708_v61, %v1290_v50  ;;  %v718_v1 = vsub.s32 %v715_v10, %v1290_v50 }
 0x37b   : > { %677 = vperm.xlu0 %1052, %v657_v46   ;;  %v725_v2 = vsub.s32 %v722_v11, %v1290_v50  ;;  %v732_v5 = vsub.s32 %v729_v12, %v1290_v50  ;;  %v739_v16 = vsub.s32 %v736_v0, %v1290_v50 }
 0x37c   : > { %1001 = vmatpush3.bf16.msra.mxu1 %v1000_v36 }
 0x37d   : > { %1002 = vmatprep.subr.bf16.mxu1 %v1152_v56 }
 0x37f   : > { %680 = vperm.xlu0 %1052, %v658_v53  }
 0x380   : > { %1004 = vmatpush3.bf16.msra.mxu1 %v1003_v40 }
 0x381   : > { %1005 = vmatprep.subr.bf16.mxu1 %v1152_v56 }
 0x383   : > { %683 = vperm.xlu0 %1052, %v659_v55  }
 0x384   : > { %1007 = vmatpush3.bf16.msra.mxu1 %v1006_v6 }
 0x387   : > { %686 = vperm.xlu0 %1052, %v660_v21  }
 0x38b   : > { %689 = vperm.xlu0 %1052, %v661_v48  }
 0x38f   : > { %692 = vperm.xlu0 %1052, %v662_v24  }
 0x393   : > { %695 = vperm.xlu0 %1052, %v663_v58  }
 0x3f6   : > { %v675_v44 = vpop.permute.xlu0 %674 }
 0x3f7   : > { %v700_v17 = vrot.slane %v675_v44, %v1294_v52 }
 0x3fa   : > { %v678_v59 = vpop.permute.xlu0 %677 }
 0x3fb   : > { %v705_v4 = vrot.slane %v678_v59, %v704_v63 }
 0x3fd   : > { %v707_v25 = vsel %vm706_vm10, %v705_v4, %v700_v17 }
 0x3fe   : > { %v681_v8 = vpop.permute.xlu0 %680 }
 0x3ff   : > { %v712_v15 = vrot.slane %v681_v8, %v711_v13 }
 0x401   : > { %v714_v28 = vsel %vm713_vm11, %v712_v15, %v707_v25 }
 0x402   : > { %v684_v9 = vpop.permute.xlu0 %683 }
 0x403   : > { %v719_v18 = vrot.slane %v684_v9, %v718_v1 }
 0x405   : > { %v721_v30 = vsel %vm720_vm12, %v719_v18, %v714_v28 }
 0x406   : > { %v687_v62 = vpop.permute.xlu0 %686 }
 0x407   : > { %v726_v19 = vrot.slane %v687_v62, %v725_v2 }
 0x409   : > { %v728_v31 = vsel %vm727_vm13, %v726_v19, %v721_v30 }
 0x40a   : > { %v690_v3 = vpop.permute.xlu0 %689 }
 0x40b   : > { %v733_v26 = vrot.slane %v690_v3, %v732_v5 }
 0x40d   : > { %v735_v32 = vsel %vm734_vm14, %v733_v26, %v728_v31 }
 0x40e   : > { %v693_v20 = vpop.permute.xlu0 %692 }
 0x40f   : > { %v740_v49 = vrot.slane %v693_v20, %v739_v16 }
 0x411   : > { %v742_v35 = vsel %vm741_vm15, %v740_v49, %v735_v32 }
 0x412   : > { %v696_v52 = vpop.permute.xlu0 %695 }
 0x413   : > { %v747_v34 = vrot.slane %v696_v52, %v746_v27 }
 0x415   : > { %v749_v37 = vsel %vm748_vm1, %v747_v34, %v742_v35 }
 0x416   : > { %v757_v50 = vmul.f32 %v749_v37, %v664_v33 }
 0x418   : > { %986 = vmatmul.mubr.msk.f32.vlgmr.msra.gmra.mrb[0].mxu1 %vm758_vm2, %v757_v50 }
 0x4eb   : > { %v828_v38 = vpop.f32.mrb[0].mxu1 }
 0x4ec   : > { %832 = vst.msk [vmem:[%s218_s11] sm:$0xff] %vm244_vm0, %v828_v38  ;;  %v987_v39 = vpop.f32.mrb[1].mxu1 }
 0x4ed   : > { %1100 = shalt.err (!%p1097_p3)
}
 0x4ee   : > { %s1101_s26 = scalar_lea.hbm %s1399_s15, 128  ;;  %s1105_s7 = scalar_lea.hbm %s1447_s5, 256 }
 0x4ef   : > { %p1102_p4 = scmp.ne.s32.totalorder %s1399_s15, %s1101_s26  ;;  %p1106_p9 = scmp.lt.u32.totalorder %s1399_s15, %s1447_s5 }
 0x4f0   : > { %p1107_p10 = scmp.lt.u32.totalorder %s1105_s7, %s1101_s26  ;;  %p1109_p12 = scmp.lt.u32.totalorder %s1101_s26, %s1399_s15 }
 0x4f1   : > { %p1103_p7 = pnand %p1102_p4, %p1224_p5 }
 0x4f2   : > { %p1108_p11 = por %p1107_p10, %p1106_p9 }
 0x4f3   : > { %p1104_p8 = pneg %p1103_p7 }
 0x4f4   : > { %p1110_p13 = por %p1109_p12, %p1108_p11 }
 0x4f6   : > { %p1111_p0 = pnand %p1110_p13, %p1104_p8 }
 0x4f8   : > { %1114 = shalt.err (!%p1111_p0)
}
 0x4f9   : > { %1008 = dma.vmem_to_hbm [thread:$0]  (%p1224_p5), %s1401_s12, 128, %s1399_s15, %s834_s16  }
 0x4fa PF: > { %p1014_p1 = scmp.ge.s32.totalorder %s1149_s21, 2  ;;  %s859_s10 = sand.u32 1, %s1137_s18  }
 0x4fb   : > { %s860_s11 = scalar_lea.sflag [#allocation3], %s859_s10 }
 0x4fc   : > { %p1011_p2 = pnand %p1014_p1, %p1228_p6 }
 0x4fe   : > { %1132 = dma.done.wait (!%p1011_p2), %s860_s11, 128  }
 0x4ff   : > { %1134 = vsyncadd (!%p1011_p2), %s860_s11, 4294967168  ;;  %p15_p3 = scmp.ge.s32.totalorder %s1211_s24, 4   ;;  %s1450_s18 = smov %s1141_s19 }
 0x500   : > { %s1451_s19 = smov %s1145_s20  ;;  %s1452_s20 = smov %s1222_s27 }
 0x501   : > { %s1453_s21 = smov %s1211_s24  ;;  %17 = sbr.rel (!%p15_p3) target bundleno = 3 (0x3), region = 75 }
 0x508   :  { %865 = vsyncpa [#allocation3], 1 }
 0x509   :  { %867 = vsyncpa [#allocation3 + $0x1], 1 }

</bundles_post_ra>
